<compile_context>
chip_gen: v7x
topology: tpu7x:2x2x1
jax: 0.10.0
libtpu: 0.0.40
codegen_flags: <defaults>
</compile_context>

<pallas_src>
import functools

import jax
import jax.numpy as jnp
from jax.experimental import pallas as pl
from jax.experimental.pallas import tpu as pltpu


def _round_up(x, m):
    return ((x + m - 1) // m) * m


def _f1_partials_kernel(logits_ref, labels_ref,
                        tp_out_ref, ps_out_ref, cnt_out_ref,
                        tp8_ref, ps8_ref, cnt8_ref,
                        *, batch, tiles_per_par):
    g = pl.program_id(0)            # parallel group (megacore axis on v7x)
    j = pl.program_id(1)            # batch-tile reduction step within the group
    b_tile, c = logits_ref.shape

    @pl.when(j == 0)
    def _init():
        tp8_ref[...] = jnp.zeros_like(tp8_ref)
        ps8_ref[...] = jnp.zeros_like(ps8_ref)
        cnt8_ref[...] = jnp.zeros_like(cnt8_ref)

    # Logical (unclamped) row offset of this tile; rows >= batch are masked.
    tile_idx = g * tiles_per_par + j
    row_ids = tile_idx * b_tile + jax.lax.broadcasted_iota(jnp.int32, (b_tile, 1), 0)
    row_valid = row_ids < batch                                     # (b_tile, 1) bool

    # Mask garbage tail rows BEFORE max/exp; cast to f32 in-kernel so the
    # HBM stream stays in the native input dtype.
    logits = jnp.where(row_valid, logits_ref[...].astype(jnp.float32), 0.0)

    m = jnp.max(logits, axis=1, keepdims=True)
    e = jnp.exp(logits - m)
    denom = jnp.sum(e, axis=1, keepdims=True)
    rv = row_valid.astype(jnp.float32)
    probs = e * (rv / denom)                  # exact divide on a (b_tile,1) column

    labels = labels_ref[...]                                        # (b_tile, 1) int32
    class_ids = jax.lax.broadcasted_iota(jnp.int32, (b_tile, c), 1)
    onehot = jnp.where(class_ids == labels, rv, 0.0)                # (b_tile, c)

    # Minimal accumulation set; per-8-row sublane-group partial sums (VALU adds),
    # cross-sublane collapse deferred to finalize.
    grp = b_tile // 8
    tp8_ref[...] += jnp.sum((probs * onehot).reshape(grp, 8, c), axis=0)
    ps8_ref[...] += jnp.sum(probs.reshape(grp, 8, c), axis=0)
    cnt8_ref[...] += jnp.sum(onehot.reshape(grp, 8, c), axis=0)

    @pl.when(j == pl.num_programs(1) - 1)
    def _finalize():
        tp_out_ref[...] = jnp.sum(tp8_ref[...], axis=0, keepdims=True).reshape(1, 1, c)
        ps_out_ref[...] = jnp.sum(ps8_ref[...], axis=0, keepdims=True).reshape(1, 1, c)
        cnt_out_ref[...] = jnp.sum(cnt8_ref[...], axis=0, keepdims=True).reshape(1, 1, c)


def f1_loss(y_pred, y_true, *, epsilon=1e-7, b_tile=None, n_par=2,
            vmem_budget_bytes=12 * 1024 * 1024):
    """Pallas TPU F1Loss. y_pred: (B, C) float logits, y_true: (B,) int labels -> scalar."""
    B, C = y_pred.shape
    in_bytes = jnp.dtype(y_pred.dtype).itemsize
    lane_w = _round_up(C, 128)                 # lane-padded VMEM width per row

    if b_tile is None:
        # 2 double-buffered logits tiles + 2 double-buffered (lane-padded) label tiles.
        per_row = 2 * lane_w * in_bytes + 2 * 128 * 4
        b_tile = vmem_budget_bytes // per_row
        b_tile = min(4096, (b_tile // 8) * 8, _round_up(B, 8))
    b_tile = max(8, _round_up(b_tile, 8))

    n_tiles = pl.cdiv(B, b_tile)
    n_par = max(1, min(n_par, n_tiles))
    tiles_per_par = pl.cdiv(n_tiles, n_par)

    def in_map(g, j):
        # Clamp so grid steps past the last real tile re-read it (fully row-masked).
        return (jnp.minimum(g * tiles_per_par + j, n_tiles - 1), 0)

    approx_vmem = (2 * b_tile * lane_w * in_bytes      # double-buffered logits
                   + 2 * b_tile * 128 * 4              # double-buffered labels
                   + 3 * 8 * lane_w * 4                # accumulators
                   + (1 << 20))
    vmem_limit = int(min(96 * 1024 * 1024, max(32 * 1024 * 1024, 2 * approx_vmem)))

    kernel = functools.partial(_f1_partials_kernel, batch=B,
                               tiles_per_par=tiles_per_par)

    out_shape = (
        jax.ShapeDtypeStruct((n_par, 1, C), jnp.float32),
        jax.ShapeDtypeStruct((n_par, 1, C), jnp.float32),
        jax.ShapeDtypeStruct((n_par, 1, C), jnp.float32),
    )
    out_specs = [pl.BlockSpec((1, 1, C), lambda g, j: (g, 0, 0))] * 3

    tp_p, ps_p, cnt_p = pl.pallas_call(
        kernel,
        out_shape=out_shape,
        grid_spec=pltpu.PrefetchScalarGridSpec(
            num_scalar_prefetch=0,
            grid=(n_par, tiles_per_par),
            in_specs=[
                pl.BlockSpec((b_tile, C), in_map),     # logits, native dtype
                pl.BlockSpec((b_tile, 1), in_map),     # labels, int32
            ],
            out_specs=out_specs,
            scratch_shapes=[pltpu.VMEM((8, C), jnp.float32)] * 3,
        ),
        compiler_params=pltpu.CompilerParams(
            dimension_semantics=("parallel", "arbitrary"),
            vmem_limit_bytes=vmem_limit,
        ),
    )(y_pred, y_true.astype(jnp.int32).reshape(B, 1))

    # Tiny finalize in plain JAX: sum per-group partials, derive fp/fn, F1, mean.
    tp = jnp.sum(tp_p.reshape(n_par, C), axis=0)
    ps = jnp.sum(ps_p.reshape(n_par, C), axis=0)
    cnt = jnp.sum(cnt_p.reshape(n_par, C), axis=0)
    fp = ps - tp
    fn = cnt - tp
    eps = jnp.float32(epsilon)
    precision = tp / (tp + fp + eps)
    recall = tp / (tp + fn + eps)
    f1 = 2.0 * precision * recall / (precision + recall + eps)
    return (1.0 - jnp.mean(f1)).astype(jnp.float32)


def f1_loss_ref(y_pred, y_true, epsilon=1e-7):
    """Pure-JAX reference matching the torch F1Loss."""
    probs = jax.nn.softmax(y_pred.astype(jnp.float32), axis=1)
    onehot = jax.nn.one_hot(y_true, y_pred.shape[1], dtype=jnp.float32)
    tp = jnp.sum(probs * onehot, axis=0)
    fp = jnp.sum(probs * (1.0 - onehot), axis=0)
    fn = jnp.sum((1.0 - probs) * onehot, axis=0)
    precision = tp / (tp + fp + epsilon)
    recall = tp / (tp + fn + epsilon)
    f1 = 2.0 * precision * recall / (precision + recall + epsilon)
    return 1.0 - jnp.mean(f1)


if __name__ == "__main__":
    # Small shapes consistent with the module; b_tile=8 forces a multi-step
    # reduction grid, both parallel groups, a ragged last tile and a clamped
    # out-of-range grid step.  The second call exercises the auto-sized path.
    B, C = 20, 4
    key = jax.random.PRNGKey(0)
    k_pred, k_true = jax.random.split(key)
    y_pred = jax.random.normal(k_pred, (B, C), jnp.float32)
    y_true = jax.random.randint(k_true, (B,), 0, C)

    loss_small = f1_loss(y_pred, y_true, b_tile=8)
    loss_auto = f1_loss(y_pred, y_true)
    jax.block_until_ready((loss_small, loss_auto))

    ref = f1_loss_ref(y_pred, y_true)
    assert loss_small.shape == () and loss_small.dtype == jnp.float32
    assert abs(float(loss_small) - float(ref)) < 1e-4, (float(loss_small), float(ref))
    assert abs(float(loss_auto) - float(ref)) < 1e-4, (float(loss_auto), float(ref))
    print("KERNEL_OK")
</pallas_src>

<mosaic_0001>
module attributes {stable_mosaic.version = 11 : i64} {
  func.func @_f1_partials_kernel(%arg0: i32, %arg1: i32, %arg2: memref<8x4xf32, #tpu.memory_space<vmem>>, %arg3: memref<8x1xi32, #tpu.memory_space<vmem>>, %arg4: memref<1x1x4xf32, #tpu.memory_space<vmem>>, %arg5: memref<1x1x4xf32, #tpu.memory_space<vmem>>, %arg6: memref<1x1x4xf32, #tpu.memory_space<vmem>>, %arg7: memref<8x4xf32, #tpu.memory_space<vmem>>, %arg8: memref<8x4xf32, #tpu.memory_space<vmem>>, %arg9: memref<8x4xf32, #tpu.memory_space<vmem>>) attributes {dimension_semantics = [#tpu.dimension_semantics<parallel>, #tpu.dimension_semantics<arbitrary>], iteration_bounds = array<i64: 2, 2>, scalar_prefetch = 0 : i64, scratch_operands = 3 : i64, tpu.core_type = #tpu.core_type<tc>, window_params = [{transform_indices = @transform_0, window_bounds = array<i64: 8, 4>}, {transform_indices = @transform_1, window_bounds = array<i64: 8, 1>}, {transform_indices = @transform_2, window_bounds = array<i64: 1, 1, 4>}, {transform_indices = @transform_3, window_bounds = array<i64: 1, 1, 4>}, {transform_indices = @transform_4, window_bounds = array<i64: 1, 1, 4>}]} {
    %c0_i32 = arith.constant 0 : i32
    %0 = arith.cmpi eq, %arg1, %c0_i32 : i32
    %1 = arith.extui %0 : i1 to i32
    %c0_i32_0 = arith.constant 0 : i32
    %2 = arith.cmpi ne, %1, %c0_i32_0 : i32
    scf.if %2 {
      %cst_23 = arith.constant 0.000000e+00 : f32
      %55 = vector.broadcast %cst_23 : f32 to vector<8x4xf32>
      %c0_24 = arith.constant 0 : index
      %c0_25 = arith.constant 0 : index
      %56 = vector.load %arg7[%c0_24, %c0_25] : memref<8x4xf32, #tpu.memory_space<vmem>>, vector<8x4xf32>
      tpu.vector_store %arg7[%c0_24, %c0_25], %55 {strides = array<i32>} : memref<8x4xf32, #tpu.memory_space<vmem>>, vector<8x4xf32>,
      %cst_26 = arith.constant 0.000000e+00 : f32
      %57 = vector.broadcast %cst_26 : f32 to vector<8x4xf32>
      %c0_27 = arith.constant 0 : index
      %c0_28 = arith.constant 0 : index
      %58 = vector.load %arg8[%c0_27, %c0_28] : memref<8x4xf32, #tpu.memory_space<vmem>>, vector<8x4xf32>
      tpu.vector_store %arg8[%c0_27, %c0_28], %57 {strides = array<i32>} : memref<8x4xf32, #tpu.memory_space<vmem>>, vector<8x4xf32>,
      %cst_29 = arith.constant 0.000000e+00 : f32
      %59 = vector.broadcast %cst_29 : f32 to vector<8x4xf32>
      %c0_30 = arith.constant 0 : index
      %c0_31 = arith.constant 0 : index
      %60 = vector.load %arg9[%c0_30, %c0_31] : memref<8x4xf32, #tpu.memory_space<vmem>>, vector<8x4xf32>
      tpu.vector_store %arg9[%c0_30, %c0_31], %59 {strides = array<i32>} : memref<8x4xf32, #tpu.memory_space<vmem>>, vector<8x4xf32>,
    } else {
    }
    %c2_i32 = arith.constant 2 : i32
    %3 = arith.muli %arg0, %c2_i32 : i32
    %4 = arith.addi %3, %arg1 : i32
    %c8_i32 = arith.constant 8 : i32
    %5 = arith.muli %4, %c8_i32 : i32
    %6 = tpu.iota {dimensions = array<i32: 0>} : vector<8x1xi32>
    %7 = vector.broadcast %5 : i32 to vector<8x1xi32>
    %8 = arith.addi %7, %6 : vector<8x1xi32>
    %c20_i32 = arith.constant 20 : i32
    %9 = vector.broadcast %c20_i32 : i32 to vector<8x1xi32>
    %10 = arith.cmpi slt, %8, %9 : vector<8x1xi32>
    %c0 = arith.constant 0 : index
    %c0_1 = arith.constant 0 : index
    %11 = vector.load %arg2[%c0, %c0_1] : memref<8x4xf32, #tpu.memory_space<vmem>>, vector<8x4xf32>
    %cst = arith.constant 0.000000e+00 : f32
    %12 = vector.shape_cast %10 : vector<8x1xi1> to vector<8x1xi1>
    %13 = vector.broadcast %12 : vector<8x1xi1> to vector<8x4xi1>
    %14 = vector.broadcast %cst : f32 to vector<8x4xf32>
    %15 = arith.select %13, %11, %14 : vector<8x4xi1>, vector<8x4xf32>
    %cst_2 = arith.constant dense<0xFF800000> : vector<8xf32>
    %16 = vector.multi_reduction <maximumf>, %15, %cst_2 [1] : vector<8x4xf32> to vector<8xf32>
    %17 = vector.shape_cast %16 : vector<8xf32> to vector<8x1xf32>
    %18 = vector.broadcast %17 : vector<8x1xf32> to vector<8x4xf32>
    %19 = arith.subf %15, %18 : vector<8x4xf32>
    %20 = math.exp %19 : vector<8x4xf32>
    %cst_3 = arith.constant dense<0.000000e+00> : vector<8xf32>
    %21 = vector.multi_reduction <add>, %20, %cst_3 [1] : vector<8x4xf32> to vector<8xf32>
    %22 = vector.shape_cast %21 : vector<8xf32> to vector<8x1xf32>
    %23 = arith.extui %10 : vector<8x1xi1> to vector<8x1xi32>
    %24 = arith.sitofp %23 : vector<8x1xi32> to vector<8x1xf32>
    %25 = arith.divf %24, %22 : vector<8x1xf32>
    %26 = vector.broadcast %25 : vector<8x1xf32> to vector<8x4xf32>
    %27 = arith.mulf %20, %26 : vector<8x4xf32>
    %c0_4 = arith.constant 0 : index
    %c0_5 = arith.constant 0 : index
    %28 = vector.load %arg3[%c0_4, %c0_5] : memref<8x1xi32, #tpu.memory_space<vmem>>, vector<8x1xi32>
    %29 = tpu.iota {dimensions = array<i32: 1>} : vector<8x4xi32>
    %30 = vector.broadcast %28 : vector<8x1xi32> to vector<8x4xi32>
    %31 = arith.cmpi eq, %29, %30 : vector<8x4xi32>
    %cst_6 = arith.constant 0.000000e+00 : f32
    %32 = vector.shape_cast %24 : vector<8x1xf32> to vector<8x1xf32>
    %33 = vector.broadcast %32 : vector<8x1xf32> to vector<8x4xf32>
    %34 = vector.broadcast %cst_6 : f32 to vector<8x4xf32>
    %35 = arith.select %31, %33, %34 : vector<8x4xi1>, vector<8x4xf32>
    %c0_7 = arith.constant 0 : index
    %c0_8 = arith.constant 0 : index
    %36 = vector.load %arg7[%c0_7, %c0_8] : memref<8x4xf32, #tpu.memory_space<vmem>>, vector<8x4xf32>
    %37 = arith.mulf %27, %35 : vector<8x4xf32>
    %38 = vector.shape_cast %37 : vector<8x4xf32> to vector<1x8x4xf32>
    %cst_9 = arith.constant dense<0.000000e+00> : vector<8x4xf32>
    %39 = vector.multi_reduction <add>, %38, %cst_9 [0] : vector<1x8x4xf32> to vector<8x4xf32>
    %40 = arith.addf %36, %39 : vector<8x4xf32>
    %c0_10 = arith.constant 0 : index
    %c0_11 = arith.constant 0 : index
    %41 = vector.load %arg7[%c0_10, %c0_11] : memref<8x4xf32, #tpu.memory_space<vmem>>, vector<8x4xf32>
    tpu.vector_store %arg7[%c0_10, %c0_11], %40 {strides = array<i32>} : memref<8x4xf32, #tpu.memory_space<vmem>>, vector<8x4xf32>,
    %c0_12 = arith.constant 0 : index
    %c0_13 = arith.constant 0 : index
    %42 = vector.load %arg8[%c0_12, %c0_13] : memref<8x4xf32, #tpu.memory_space<vmem>>, vector<8x4xf32>
    %43 = vector.shape_cast %27 : vector<8x4xf32> to vector<1x8x4xf32>
    %cst_14 = arith.constant dense<0.000000e+00> : vector<8x4xf32>
    %44 = vector.multi_reduction <add>, %43, %cst_14 [0] : vector<1x8x4xf32> to vector<8x4xf32>
    %45 = arith.addf %42, %44 : vector<8x4xf32>
    %c0_15 = arith.constant 0 : index
    %c0_16 = arith.constant 0 : index
    %46 = vector.load %arg8[%c0_15, %c0_16] : memref<8x4xf32, #tpu.memory_space<vmem>>, vector<8x4xf32>
    tpu.vector_store %arg8[%c0_15, %c0_16], %45 {strides = array<i32>} : memref<8x4xf32, #tpu.memory_space<vmem>>, vector<8x4xf32>,
    %c0_17 = arith.constant 0 : index
    %c0_18 = arith.constant 0 : index
    %47 = vector.load %arg9[%c0_17, %c0_18] : memref<8x4xf32, #tpu.memory_space<vmem>>, vector<8x4xf32>
    %48 = vector.shape_cast %35 : vector<8x4xf32> to vector<1x8x4xf32>
    %cst_19 = arith.constant dense<0.000000e+00> : vector<8x4xf32>
    %49 = vector.multi_reduction <add>, %48, %cst_19 [0] : vector<1x8x4xf32> to vector<8x4xf32>
    %50 = arith.addf %47, %49 : vector<8x4xf32>
    %c0_20 = arith.constant 0 : index
    %c0_21 = arith.constant 0 : index
    %51 = vector.load %arg9[%c0_20, %c0_21] : memref<8x4xf32, #tpu.memory_space<vmem>>, vector<8x4xf32>
    tpu.vector_store %arg9[%c0_20, %c0_21], %50 {strides = array<i32>} : memref<8x4xf32, #tpu.memory_space<vmem>>, vector<8x4xf32>,
    %c1_i32 = arith.constant 1 : i32
    %52 = arith.cmpi eq, %arg1, %c1_i32 : i32
    %53 = arith.extui %52 : i1 to i32
    %c0_i32_22 = arith.constant 0 : i32
    %54 = arith.cmpi ne, %53, %c0_i32_22 : i32
    scf.if %54 {
      %c0_23 = arith.constant 0 : index
      %c0_24 = arith.constant 0 : index
      %55 = vector.load %arg7[%c0_23, %c0_24] : memref<8x4xf32, #tpu.memory_space<vmem>>, vector<8x4xf32>
      %cst_25 = arith.constant dense<0.000000e+00> : vector<4xf32>
      %56 = vector.multi_reduction <add>, %55, %cst_25 [0] : vector<8x4xf32> to vector<4xf32>
      %57 = vector.shape_cast %56 : vector<4xf32> to vector<1x4xf32>
      %58 = vector.shape_cast %57 : vector<1x4xf32> to vector<1x1x4xf32>
      %c0_26 = arith.constant 0 : index
      %c0_27 = arith.constant 0 : index
      %c0_28 = arith.constant 0 : index
      %59 = vector.load %arg4[%c0_26, %c0_27, %c0_28] : memref<1x1x4xf32, #tpu.memory_space<vmem>>, vector<1x1x4xf32>
      tpu.vector_store %arg4[%c0_26, %c0_27, %c0_28], %58 {strides = array<i32>} : memref<1x1x4xf32, #tpu.memory_space<vmem>>, vector<1x1x4xf32>,
      %c0_29 = arith.constant 0 : index
      %c0_30 = arith.constant 0 : index
      %60 = vector.load %arg8[%c0_29, %c0_30] : memref<8x4xf32, #tpu.memory_space<vmem>>, vector<8x4xf32>
      %cst_31 = arith.constant dense<0.000000e+00> : vector<4xf32>
      %61 = vector.multi_reduction <add>, %60, %cst_31 [0] : vector<8x4xf32> to vector<4xf32>
      %62 = vector.shape_cast %61 : vector<4xf32> to vector<1x4xf32>
      %63 = vector.shape_cast %62 : vector<1x4xf32> to vector<1x1x4xf32>
      %c0_32 = arith.constant 0 : index
      %c0_33 = arith.constant 0 : index
      %c0_34 = arith.constant 0 : index
      %64 = vector.load %arg5[%c0_32, %c0_33, %c0_34] : memref<1x1x4xf32, #tpu.memory_space<vmem>>, vector<1x1x4xf32>
      tpu.vector_store %arg5[%c0_32, %c0_33, %c0_34], %63 {strides = array<i32>} : memref<1x1x4xf32, #tpu.memory_space<vmem>>, vector<1x1x4xf32>,
      %c0_35 = arith.constant 0 : index
      %c0_36 = arith.constant 0 : index
      %65 = vector.load %arg9[%c0_35, %c0_36] : memref<8x4xf32, #tpu.memory_space<vmem>>, vector<8x4xf32>
      %cst_37 = arith.constant dense<0.000000e+00> : vector<4xf32>
      %66 = vector.multi_reduction <add>, %65, %cst_37 [0] : vector<8x4xf32> to vector<4xf32>
      %67 = vector.shape_cast %66 : vector<4xf32> to vector<1x4xf32>
      %68 = vector.shape_cast %67 : vector<1x4xf32> to vector<1x1x4xf32>
      %c0_38 = arith.constant 0 : index
      %c0_39 = arith.constant 0 : index
      %c0_40 = arith.constant 0 : index
      %69 = vector.load %arg6[%c0_38, %c0_39, %c0_40] : memref<1x1x4xf32, #tpu.memory_space<vmem>>, vector<1x1x4xf32>
      tpu.vector_store %arg6[%c0_38, %c0_39, %c0_40], %68 {strides = array<i32>} : memref<1x1x4xf32, #tpu.memory_space<vmem>>, vector<1x1x4xf32>,
    } else {
    }
    return
  }
  func.func @transform_0(%arg0: i32, %arg1: i32) -> (i32, i32) {
    %c2_i32 = arith.constant 2 : i32
    %0 = arith.muli %arg0, %c2_i32 : i32
    %1 = arith.addi %0, %arg1 : i32
    %c2_i32_0 = arith.constant 2 : i32
    %2 = arith.minsi %1, %c2_i32_0 : i32
    %c0_i32 = arith.constant 0 : i32
    %c0_i32_1 = arith.constant 0 : i32
    return %2, %c0_i32 : i32, i32
  }
  func.func @transform_1(%arg0: i32, %arg1: i32) -> (i32, i32) {
    %c2_i32 = arith.constant 2 : i32
    %0 = arith.muli %arg0, %c2_i32 : i32
    %1 = arith.addi %0, %arg1 : i32
    %c2_i32_0 = arith.constant 2 : i32
    %2 = arith.minsi %1, %c2_i32_0 : i32
    %c0_i32 = arith.constant 0 : i32
    %c0_i32_1 = arith.constant 0 : i32
    return %2, %c0_i32 : i32, i32
  }
  func.func @transform_2(%arg0: i32, %arg1: i32) -> (i32, i32, i32) {
    %c0_i32 = arith.constant 0 : i32
    %c0_i32_0 = arith.constant 0 : i32
    %c0_i32_1 = arith.constant 0 : i32
    return %arg0, %c0_i32, %c0_i32_0 : i32, i32, i32
  }
  func.func @transform_3(%arg0: i32, %arg1: i32) -> (i32, i32, i32) {
    %c0_i32 = arith.constant 0 : i32
    %c0_i32_0 = arith.constant 0 : i32
    %c0_i32_1 = arith.constant 0 : i32
    return %arg0, %c0_i32, %c0_i32_0 : i32, i32, i32
  }
  func.func @transform_4(%arg0: i32, %arg1: i32) -> (i32, i32, i32) {
    %c0_i32 = arith.constant 0 : i32
    %c0_i32_0 = arith.constant 0 : i32
    %c0_i32_1 = arith.constant 0 : i32
    return %arg0, %c0_i32, %c0_i32_0 : i32, i32, i32
  }
}

</mosaic_0001>

<bundles_post_ra>
// kernel: tpu_custom_call.1
= control target key start
LH: loop header
LB: loop body
LE: loop exit
PB: predicated region body
PF: predicated region fallthrough
CT: control target
= control target key end

     0   :  { %10 = vsyncpa [#allocation6], 0  ;;  %s1102_s0 = inlined_call_operand.vmem [shape: f32[20,4], index: 0, kind: input, shape index: {}]   ;;  %s1103_s1 = inlined_call_operand.vmem [shape: s32[20,1], index: 1, kind: input, shape index: {}]   ;;  %s1104_s2 = inlined_call_operand.hbm [shape: f32[2,1,4], index: 2, kind: output, shape index: {0}]   ;;  %s1105_s3 = inlined_call_operand.hbm [shape: f32[2,1,4], index: 3, kind: output, shape index: {1}]   ;;  %s1106_s4 = inlined_call_operand.hbm [shape: f32[2,1,4], index: 4, kind: output, shape index: {2}]  }
   0x1   :  { %12 = vsyncpa [#allocation6 + $0x1], 0 }
   0x2   :  { %13 = vsyncpa [#allocation8], 0 }
   0x3   :  { %15 = vsyncpa [#allocation8 + $0x1], 0  ;;  %s864_s15 = smov 0   ;;  %s866_s16 = smov 0  }
   0x4   :  { %s868_s17 = smov 0   ;;  %s870_s18 = smov 0  }
   0x5   :  { %s872_s19 = smov 0   ;;  %s874_s20 = smov 0  }
   0x6   :  { %s876_s21 = smov 0   ;;  %s878_s22 = smov 0  }
   0x7 LB: > { %s1108_s23 = sadd.s32 4294967295, %s831_s22   ;;  %s1107_s24 = sadd.s32 4294967294, %s831_s22   ;;  %s831_s22 = sphi %s878_s22, %s21_s22   ;;  %s827_s21 = sphi %s876_s21, %s1124_s21   ;;  %s823_s20 = sphi %s874_s20, %s1123_s20   ;;  %s819_s19 = sphi %s872_s19, %s1122_s19   ;;  %s815_s18 = sphi %s870_s18, %s1121_s18   ;;  %s811_s17 = sphi %s868_s17, %s1120_s17   ;;  %s807_s16 = sphi %s866_s16, %s1119_s16   ;;  %s803_s15 = sphi %s864_s15, %s1118_s15  }
   0x8   : > { %s30_s25 = sadd.s32 1, %s823_s20  ;;  %s33_s26 = sadd.s32 1, %s827_s21 }
   0x9   : > { %p31_p0 = scmp.ge.s32.totalorder %s30_s25, 2  ;;  %p118_p1 = scmp.ne.s32.totalorder %s811_s17, %s807_s16 }
   0xa   : > { %p119_p2 = scmp.eq.s32.totalorder %s1108_s23, 3  ;;  %p124_p4 = scmp.ne.s32.totalorder %s807_s16, %s803_s15 }
   0xb   : > { %s1126_s25 = smov (%p31_p0, %s30_s25), 0  ;;  %s1128_s26 = smov (!%p31_p0, %s33_s26), %s827_s21 }
   0xc   : > { %p915_p3 = por %p119_p2, %p118_p1  ;;  %p35_p5 = scmp.ge.s32.totalorder %s1128_s26, 2 }
   0xd   : > { %p125_p6 = scmp.eq.s32.totalorder %s1107_s24, 3  ;;  %p566_p7 = scmp.ge.s32.totalorder %s831_s22, 1 }
   0xe   : > { %p225_p8 = scmp.lt.s32.totalorder %s831_s22, 5  ;;  %s1130_s26 = smov (%p35_p5, %s1128_s26), 0 }
   0xf   : > { %1112 = sst [smem:[#allocation12_spill]] %s1130_s26  ;;  %p927_p9 = por %p125_p6, %p124_p4 }
  0x10   : > { %p226_p10 = pnand %p566_p7, %p225_p8  ;;  %s105_s29 = ssub.s32 %s827_s21, %s1130_s26 }
  0x11   : > { %s108_s30 = sadd.s32 1, %s811_s17  ;;  %p106_p11 = scmp.eq.s32.totalorder %s105_s29, 0 }
  0x12   : > { %229 = sbr.rel (%p226_p10) target bundleno = 456 (0x1c8), region = 28  ;;  %s938_s6 = sand.u32 (!%p226_p10), 1, %s807_s16  }
  0x13   : > { %s935_s5 = scalar_select %p106_p11, %s811_s17, %s108_s30  }
  0x14   : > { %s567_s7 = sshll.u32 (!%p226_p10), %s819_s19, 1  ;;  %s256_s24 = scalar_lea.vmem (!%p226_p10), [#allocation5], %s938_s6 }
  0x15   : > { %s270_s8 = sadd.s32 (!%p226_p10), %s815_s18, %s567_s7  ;;  %s262_s23 = scalar_lea.vmem (!%p226_p10), [#allocation7], %s938_s6 }
  0x16   : > { %p271_p12 = scmp.lt.s32.totalorder (!%p226_p10), %s270_s8, 2  ;;  %s1110_s26 = scalar_lea.vmem (!%p226_p10), [#allocation9], %s938_s6 }
  0x17   : > { %p577_p13 = scmp.ne.s32.totalorder (!%p226_p10), %s815_s18, 0 }
  0x19   : > { %s272_s9 = scalar_select %p271_p12, %s270_s8, 2 }
  0x1a   : > { %296 = sbr.rel (%p577_p13) target bundleno = 33 (0x21), region = 32  ;;  %vm297_vm0 = vcmask (!%p577_p13), 31744   ;;  %v833_v0 = vmov (!%p577_p13), 0.0  }
  0x1b   : > { %s1132_s9 = smov (!%p271_p12, %s272_s9), 2  ;;  %298 = vst.msk [vmem:[#allocation2] sm:$0xff] (!%p577_p13), %vm297_vm0, %v833_v0  ;;  %299 = vst.msk [vmem:[#allocation3] sm:$0xff] (!%p577_p13), %vm297_vm0, %v833_v0 }
  0x1c   : > { %s571_s10 = sshll.u32 %s1132_s9, 3  ;;  %300 = vst.msk [vmem:[#allocation4] sm:$0xff] (!%p577_p13), %vm297_vm0, %v833_v0 }
  0x1d   : > { %s276_s13 = scalar_lea.vmem %s1102_s0, %s571_s10  ;;  %s288_s30 = scalar_lea.vmem %s1103_s1, %s571_s10 }
  0x21 PF: > { %s579_s7 = sshll.u32 %s270_s8, 3  ;;  %v304_v1 = vlaneseq  ;;  %v309_v5 = vld [vmem:[%s276_s13] sm:$0xff]  ;;  %vm313_vm1 = vcmask 31744   ;;  %v834_v9 = vmov 0   ;;  %v835_v18 = vmov 0.0   ;;  %p581_p0 = scmp.ne.s32.totalorder %s815_s18, 1 }
  0x22   : > { %v306_v2 = vstv %s579_s7  ;;  %v327_v8 = vld [vmem:[%s288_s30] sm:$0xff]  ;;  %671 = vset.pattern.permute.xlu1 %v834_v9  ;;  %672 = vset.pattern.permute.xlu0 %v834_v9  ;;  %v340_v25 = vld [vmem:[#allocation3] sm:$0xff]  ;;  %vm360_vm4 = vcmask (!%p581_p0), 24576  }
  0x23   : > { %v305_v3 = vshrl.u32 %v304_v1, 7  ;;  %331 = vperm.xlu1 %671, %v327_v8   ;;  %v329_v16 = vand.u32 127, %v304_v1  ;;  %v344_v17 = vld [vmem:[#allocation4] sm:$0xff]  ;;  %v335_v27 = vld [vmem:[#allocation2] sm:$0xff] }
  0x25   : > { %v307_v4 = vadd.s32 %v306_v2, %v305_v3 }
  0x27   : > { %vm308_vm2 = vcmp.lt.s32.totalorder %v307_v4, 20 }
  0x28   : > { %v312_v6 = vsel %vm308_vm2, %v309_v5, 0.0  ;;  %v580_v19 = vsel %vm308_vm2, 1.0, %v835_v18 }
  0x29   : > { %v314_v7 = vsel %vm313_vm1, %v312_v6, -inf }
  0x2a   : > { %315 = vmax.xlane.f32.xlu0 %v314_v7 }
  0xa2   : > { %v332_v15 = vpop.permute.xlu1 %331 }
  0xa3   : > { %vm333_vm3 = vcmp.eq.s32.totalorder %v329_v16, %v332_v15 }
  0xa4   : > { %v334_v20 = vsel %vm333_vm3, %v580_v19, 0.0 }
  0xa5   : > { %v346_v21 = vadd.f32 %v344_v17, %v334_v20 }
  0xa7   : > { %347 = vst.msk [vmem:[#allocation4] sm:$0xff] %vm313_vm1, %v346_v21 }
  0xae   : > { %v371_v33 = vld [vmem:[#allocation4] sm:$0xff] (!%p581_p0) }
  0xaf   : > { %v372_v36 = vsel (!%p581_p0), %vm313_vm1, %v371_v33, 0.0 }
  0xb0   : > { %v373_v39 = vrot.slane (!%p581_p0), %v372_v36, 4 }
  0xb2   : > { %v374_v42 = vadd.f32 (!%p581_p0), %v373_v39, %v372_v36 }
  0xb4   : > { %v375_v45 = vrot.slane (!%p581_p0), %v374_v42, 2 }
  0xb6   : > { %v376_v48 = vadd.f32 (!%p581_p0), %v375_v45, %v374_v42 }
  0xb7   : > { %v316_v10 = vpop.xlane.xlu0 %315 }
  0xb8   : > { %v317_v11 = vsub.f32 %v312_v6, %v316_v10  ;;  %v377_v51 = vrot.slane (!%p581_p0), %v376_v48, 1 }
  0xba   : > { %v318_v12 = vmul.f32 1.442695, %v317_v11  ;;  %v378_v54 = vadd.f32 (!%p581_p0), %v377_v51, %v376_v48 }
  0xbc   : > { %673 = vpow2.f32 %v318_v12  ;;  %379 = vst.msk [vmem:[%s1110_s26] sm:$0x1] (!%p581_p0), %vm360_vm4, %v378_v54 }
  0xc6   : > { %v674_v13 = vpop.eup %673 }
  0xc7   : > { %v320_v14 = vsel %vm313_vm1, %v674_v13, 0.0 }
  0xc8   : > { %321 = vadd.xlane.f32.xlu0 %v320_v14 }
 0x155   : > { %v322_v22 = vpop.xlane.xlu0 %321 }
 0x156   : > { %675 = vrcp.f32 %v322_v22 }
 0x160   : > { %v676_v23 = vpop.eup %675 }
 0x161   : > { %v325_v24 = vmul.f32 %v676_v23, %v580_v19 }
 0x163   : > { %v326_v26 = vmul.f32 %v674_v13, %v325_v24  ;;  %351 = sbr.rel (%p581_p0) target bundleno = 383 (0x17f), region = 36 }
 0x165   : > { %v336_v28 = vmul.f32 %v334_v20, %v326_v26  ;;  %v342_v29 = vadd.f32 %v340_v25, %v326_v26 }
 0x167   : > { %v338_v30 = vadd.f32 %v336_v28, %v335_v27  ;;  %343 = vst.msk [vmem:[#allocation3] sm:$0xff] %vm313_vm1, %v342_v29 }
 0x169   : > { %339 = vst.msk [vmem:[#allocation2] sm:$0xff] %vm313_vm1, %v338_v30 }
 0x16e   : > { %v362_v32 = vld [vmem:[#allocation3] sm:$0xff] }
 0x16f   : > { %v363_v35 = vsel %vm313_vm1, %v362_v32, 0.0 }
 0x170   : > { %v352_v31 = vld [vmem:[#allocation2] sm:$0xff]  ;;  %v364_v38 = vrot.slane %v363_v35, 4 }
 0x171   : > { %v353_v34 = vsel %vm313_vm1, %v352_v31, 0.0 }
 0x172   : > { %v354_v37 = vrot.slane %v353_v34, 4  ;;  %v365_v41 = vadd.f32 %v364_v38, %v363_v35 }
 0x174   : > { %v355_v40 = vadd.f32 %v354_v37, %v353_v34  ;;  %v366_v44 = vrot.slane %v365_v41, 2 }
 0x176   : > { %v356_v43 = vrot.slane %v355_v40, 2  ;;  %v367_v47 = vadd.f32 %v366_v44, %v365_v41 }
 0x178   : > { %v357_v46 = vadd.f32 %v356_v43, %v355_v40  ;;  %v368_v50 = vrot.slane %v367_v47, 1 }
 0x17a   : > { %v358_v49 = vrot.slane %v357_v46, 1  ;;  %v369_v53 = vadd.f32 %v368_v50, %v367_v47 }
 0x17c   : > { %v359_v52 = vadd.f32 %v358_v49, %v357_v46  ;;  %370 = vst.msk [vmem:[%s262_s23] sm:$0x1] %vm360_vm4, %v369_v53 }
 0x17e   : > { %361 = vst.msk [vmem:[%s256_s24] sm:$0x1] %vm360_vm4, %v359_v52 }
 0x17f PF: > { %s1114_s18 = sadd.s32 4294967295, %s831_s22   ;;  %s974_s9 = sshll.u32 %s819_s19, 4 }
 0x180   : > { %s971_s8 = sand.u32 1, %s1114_s18   ;;  %s980_s12 = scalar_lea.hbm %s1105_s3, %s974_s9 }
 0x181   : > { %s414_s13 = sshll.u32 %s262_s23, 4  ;;  %s990_s30 = scalar_lea.hbm %s1104_s2, %s974_s9  ;;  %s984_s13 = int_to_ptr.vmem [resolvable:$true] %s414_s13 }
 0x182   : > { %s385_s19 = scalar_lea.sflag [#allocation8], %s971_s8  ;;  %s677_s7 = scalar_lea.vmem %s984_s13, 16 }
 0x183   : > { %p678_p1 = scmp.ne.s32.totalorder %s984_s13, %s677_s7  ;;  %s836_s18 = smov [#allocation7]  }
 0x184   : > { %s681_s10 = sshll.u32 %s836_s18, 4  ;;  %s682_s10 = int_to_ptr.vmem [resolvable:$false] %s681_s10 }
 0x185   : > { %p679_p2 = pnand %p678_p1, %p915_p3  ;;  %s683_s23 = scalar_lea.vmem %s682_s10, 32 }
 0x186   : > { %p684_p5 = scmp.lt.s32.totalorder %s984_s13, %s682_s10  ;;  %p685_p6 = scmp.lt.s32.totalorder %s683_s23, %s677_s7 }
 0x187   : > { %p680_p4 = pneg %p679_p2 }
 0x188   : > { %p686_p7 = por %p685_p6, %p684_p5 }
 0x18a   : > { %p687_p8 = pnand %p686_p7, %p680_p4 }
 0x18c   : > { %690 = shalt.err (!%p687_p8)
}
 0x18d   : > { %s691_s11 = scalar_lea.hbm %s980_s12, 16  ;;  %s695_s18 = scalar_lea.hbm %s1105_s3, 32 }
 0x18e   : > { %p692_p10 = scmp.ne.s32.totalorder %s980_s12, %s691_s11  ;;  %p696_p13 = scmp.lt.u32.totalorder %s980_s12, %s1105_s3 }
 0x18f   : > { %p697_p0 = scmp.lt.u32.totalorder %s695_s18, %s691_s11  ;;  %p699_p2 = scmp.lt.u32.totalorder %s691_s11, %s980_s12 }
 0x190   : > { %p693_p11 = pnand %p692_p10, %p915_p3 }
 0x191   : > { %p698_p1 = por %p697_p0, %p696_p13 }
 0x192   : > { %p694_p12 = pneg %p693_p11 }
 0x193   : > { %p700_p4 = por %p699_p2, %p698_p1 }
 0x195   : > { %p701_p5 = pnand %p700_p4, %p694_p12 }
 0x197   : > { %704 = shalt.err (!%p701_p5)
}
 0x198   : > { %588 = dma.vmem_to_hbm [thread:$0]  (%p915_p3), %s984_s13, 16, %s980_s12, %s385_s19  }
 0x199   : > { %s401_s26 = sshll.u32 %s256_s24, 4  ;;  %s1022_s11 = scalar_lea.hbm %s1106_s4, %s974_s9  ;;  %s1024_s26 = int_to_ptr.vmem [resolvable:$true] %s401_s26 }
 0x19a   : > { %s1115_s14 = scalar_lea.vmem [#allocation9], %s938_s6  ;;  %s381_s18 = scalar_lea.sflag [#allocation6], %s938_s6 }
 0x19b   : > { %s1028_s29 = sshll.u32 %s1115_s14, 4  ;;  %s705_s10 = scalar_lea.vmem %s1024_s26, 16  ;;  %s428_s29 = int_to_ptr.vmem [resolvable:$true] %s1028_s29 }
 0x19c   : > { %p706_p6 = scmp.ne.s32.totalorder %s1024_s26, %s705_s10  ;;  %s837_s24 = smov [#allocation5]  }
 0x19d   : > { %s709_s12 = sshll.u32 %s837_s24, 4  ;;  %s710_s12 = int_to_ptr.vmem [resolvable:$false] %s709_s12 }
 0x19e   : > { %p707_p7 = pnand %p706_p6, %p915_p3  ;;  %s711_s13 = scalar_lea.vmem %s710_s12, 32 }
 0x19f   : > { %p712_p10 = scmp.lt.s32.totalorder %s1024_s26, %s710_s12  ;;  %p713_p11 = scmp.lt.s32.totalorder %s711_s13, %s705_s10 }
 0x1a0   : > { %p708_p8 = pneg %p707_p7 }
 0x1a1   : > { %p714_p12 = por %p713_p11, %p712_p10 }
 0x1a3   : > { %p715_p13 = pnand %p714_p12, %p708_p8 }
 0x1a5   : > { %718 = shalt.err (!%p715_p13)
}
 0x1a6   : > { %s719_s6 = scalar_lea.hbm %s990_s30, 16  ;;  %s723_s23 = scalar_lea.hbm %s1104_s2, 32 }
 0x1a7   : > { %p720_p0 = scmp.ne.s32.totalorder %s990_s30, %s719_s6  ;;  %p724_p4 = scmp.lt.u32.totalorder %s990_s30, %s1104_s2 }
 0x1a8   : > { %p725_p5 = scmp.lt.u32.totalorder %s723_s23, %s719_s6  ;;  %p727_p7 = scmp.lt.u32.totalorder %s719_s6, %s990_s30 }
 0x1a9   : > { %p721_p1 = pnand %p720_p0, %p915_p3 }
 0x1aa   : > { %p726_p6 = por %p725_p5, %p724_p4 }
 0x1ab   : > { %p722_p2 = pneg %p721_p1 }
 0x1ac   : > { %p728_p8 = por %p727_p7, %p726_p6 }
 0x1ae   : > { %p729_p10 = pnand %p728_p8, %p722_p2 }
 0x1b0   : > { %732 = shalt.err (!%p729_p10)
}
 0x1b1   : > { %587 = dma.vmem_to_hbm [thread:$0]  (%p915_p3), %s1024_s26, 16, %s990_s30, %s381_s18  }
 0x1b2   : > { %s733_s10 = scalar_lea.vmem %s428_s29, 16  ;;  %s838_s12 = smov [#allocation9]  }
 0x1b3   : > { %p734_p11 = scmp.ne.s32.totalorder %s428_s29, %s733_s10  ;;  %s737_s13 = sshll.u32 %s838_s12, 4  ;;  %s738_s13 = int_to_ptr.vmem [resolvable:$false] %s737_s13 }
 0x1b4   : > { %s739_s6 = scalar_lea.vmem %s738_s13, 32  ;;  %p740_p0 = scmp.lt.s32.totalorder %s428_s29, %s738_s13 }
 0x1b5   : > { %p735_p12 = pnand %p734_p11, %p915_p3  ;;  %p741_p1 = scmp.lt.s32.totalorder %s739_s6, %s733_s10 }
 0x1b7   : > { %p736_p13 = pneg %p735_p12  ;;  %p742_p2 = por %p741_p1, %p740_p0 }
 0x1b9   : > { %p743_p4 = pnand %p742_p2, %p736_p13 }
 0x1bb   : > { %746 = shalt.err (!%p743_p4)
}
 0x1bc   : > { %s747_s30 = scalar_lea.hbm %s1022_s11, 16  ;;  %s751_s9 = scalar_lea.hbm %s1106_s4, 32 }
 0x1bd   : > { %p748_p5 = scmp.ne.s32.totalorder %s1022_s11, %s747_s30  ;;  %p752_p8 = scmp.lt.u32.totalorder %s1022_s11, %s1106_s4 }
 0x1be   : > { %p753_p10 = scmp.lt.u32.totalorder %s751_s9, %s747_s30  ;;  %p755_p12 = scmp.lt.u32.totalorder %s747_s30, %s1022_s11 }
 0x1bf   : > { %p749_p6 = pnand %p748_p5, %p915_p3 }
 0x1c0   : > { %p754_p11 = por %p753_p10, %p752_p8 }
 0x1c1   : > { %p750_p7 = pneg %p749_p6 }
 0x1c2   : > { %p756_p13 = por %p755_p12, %p754_p11 }
 0x1c4   : > { %p757_p0 = pnand %p756_p13, %p750_p7 }
 0x1c6   : > { %760 = shalt.err (!%p757_p0)
}
 0x1c7   : > { %589 = dma.vmem_to_hbm [thread:$0]  (%p915_p3), %s428_s29, 16, %s1022_s11, %s385_s19  }
 0x1c8 PF: > { %p603_p1 = scmp.ge.s32.totalorder %s831_s22, 2  ;;  %s439_s14 = sand.u32 1, %s803_s15  }
 0x1c9   : > { %s440_s24 = scalar_lea.sflag [#allocation6], %s439_s14 }
 0x1ca   : > { %p594_p2 = pnand %p603_p1, %p927_p9 }
 0x1cc   : > { %794 = dma.done.wait (!%p594_p2), %s440_s24, 16  }
 0x1cd   : > { %796 = vsyncadd (!%p594_p2), %s440_s24, 4294967280  ;;  %s1116_s10 = sadd.s32 4294967294, %s831_s22  }
 0x1ce   : > { %s447_s12 = sand.u32 1, %s1116_s10  }
 0x1cf   : > { %s448_s13 = scalar_lea.sflag [#allocation8], %s447_s12 }
 0x1d0   : > { %798 = dma.done.wait (!%p594_p2), %s448_s13, 32  }
 0x1d1   : > { %800 = vsyncadd (!%p594_p2), %s448_s13, 4294967264  ;;  %s21_s22 = sadd.s32 1, %s831_s22   ;;  %s1117_s27 = sld [smem:[#allocation12_spill]] }
 0x1d2   : > { %p18_p3 = scmp.ge.s32.totalorder %s21_s22, 6   ;;  %s1118_s15 = smov %s807_s16 }
 0x1d3   : > { %s1119_s16 = smov %s811_s17  ;;  %s1120_s17 = smov %s935_s5 }
 0x1d4   : > { %s1121_s18 = smov %s823_s20  ;;  %s1122_s19 = smov %s827_s21 }
 0x1d5   : > { %s1123_s20 = smov %s1126_s25  ;;  %20 = sbr.rel (!%p18_p3) target bundleno = 7 (0x7), region = 106 }
 0x1d7   : > { %s1124_s21 = smov %s1117_s27 }
 0x1dc   :  { %460 = vsyncpa [#allocation6], 1 }
 0x1dd   :  { %462 = vsyncpa [#allocation6 + $0x1], 1 }
 0x1de   :  { %463 = vsyncpa [#allocation8], 1 }
 0x1df   :  { %465 = vsyncpa [#allocation8 + $0x1], 1 }

</bundles_post_ra>
